<compile_context>
chip_gen: v7x
topology: tpu7x:2x2x1
jax: 0.10.0
libtpu: 0.0.40
codegen_flags: <defaults>
</compile_context>

<pallas_src>
import functools

import jax
import jax.numpy as jnp
from jax.experimental import pallas as pl
from jax.experimental.pallas import tpu as pltpu


# --------------------------------------------------------------------------
# Kernel
# --------------------------------------------------------------------------
def _ce_gmdca_kernel(logits_ref, tgt_ref, conf_ref, cnt_ref, ce_ref, *,
                     n_valid, block_rows, tiles_per_part, has_pad):
    """Process one (TB, C) logits tile: accumulate softmax column sums, one-hot
    class counts and the cross-entropy partial sum for this partition."""
    part = pl.program_id(0)      # "parallel" partition (both TCs on v7x)
    tile = pl.program_id(1)      # "arbitrary" batch-tile index inside partition

    @pl.when(tile == 0)
    def _init():
        conf_ref[...] = jnp.zeros_like(conf_ref)
        cnt_ref[...] = jnp.zeros_like(cnt_ref)
        ce_ref[...] = jnp.zeros_like(ce_ref)

    def accumulate(valid):
        # Upcast in VMEM: bf16 callers stream half the HBM bytes.
        logits = logits_ref[...].astype(jnp.float32)            # (TB, C)
        tgt = tgt_ref[...]                                        # (TB, 1) i32
        tb, c = logits.shape

        # Numerically stable row softmax; one approx reciprocal per row on the
        # EUP instead of TB*C divides.
        m = jnp.max(logits, axis=1, keepdims=True)                # (TB, 1)
        e = jnp.exp(logits - m)                                    # (TB, C)
        s = jnp.sum(e, axis=1, keepdims=True)                      # (TB, 1)
        p = e * pl.reciprocal(s, approx=True)                      # (TB, C)

        # Single predicate, reused for the class counts and the CE gather.
        cls = jax.lax.broadcasted_iota(jnp.int32, (tb, c), 1)
        hit = tgt == cls                                           # (TB, C) bool
        if valid is not None:        # only the ragged boundary tile pays this
            hit = jnp.logical_and(hit, valid)
            p = jnp.where(valid, p, 0.0)    # select, so OOB garbage can't NaN

        tgt_logit = jnp.sum(jnp.where(hit, logits, 0.0), axis=1, keepdims=True)
        ce_rows = (m + jnp.log(s)) - tgt_logit                     # lse - logit[t]
        if valid is not None:
            ce_rows = jnp.where(valid, ce_rows, 0.0)

        # Explicit rank-3 updates into the revisited (1,1,C)/(1,1,1) blocks.
        conf_ref[...] += jnp.sum(p, axis=0, keepdims=True)[None]
        cnt_ref[...] += jnp.sum(jnp.where(hit, 1.0, 0.0), axis=0,
                                keepdims=True)[None]
        ce_ref[...] += jnp.sum(ce_rows, axis=0, keepdims=True)[None]

    if has_pad:
        row0 = (part * tiles_per_part + tile) * block_rows
        ragged = row0 + block_rows > n_valid

        @pl.when(jnp.logical_not(ragged))
        def _full_tile():                  # hot path: no per-element masking
            accumulate(None)

        @pl.when(ragged)
        def _boundary_tile():              # only the tile straddling B pays this
            rows = row0 + jax.lax.broadcasted_iota(jnp.int32, (block_rows, 1), 0)
            accumulate(rows < n_valid)
    else:
        accumulate(None)


# --------------------------------------------------------------------------
# Per-generation heuristics
# --------------------------------------------------------------------------
def _default_num_partitions():
    # v7x has 2 TensorCores per chip; on v5e/v6e an extra partition is pure
    # loop overhead (smaller tiles, more grid steps), so default to 1 there.
    try:
        kind = jax.devices()[0].device_kind.lower()
    except Exception:
        return 1
    return 2 if ("v7" in kind or "7x" in kind) else 1


def _vmem_limit_bytes():
    # <= half of physical VMEM, capped at 64 MiB (and 32 MiB on v7x, whose
    # per-TensorCore VMEM is only 64 MiB).  Falls back conservatively.
    cap = 64 * 1024 * 1024
    try:
        if "v7" in jax.devices()[0].device_kind.lower():
            cap = 32 * 1024 * 1024
    except Exception:
        pass
    phys = None
    try:
        phys = int(getattr(pltpu.get_tpu_info(), "vmem_capacity_bytes", 0)) or None
    except Exception:
        phys = None
    if phys is None:
        phys = 64 * 1024 * 1024            # conservative default (v7x per-TC)
    return int(min(max(phys // 2, 16 * 1024 * 1024), cap))


def _pick_block_rows(batch, classes, itemsize, num_partitions, vmem_limit):
    # Per-row VMEM cost of one grid step:
    #   logits tile, double-buffered              : 2 * C * itemsize
    #   (tb, 1) int32 targets block pads to 128
    #   lanes in VMEM, double-buffered            : 2 * 512
    #   f32 in-kernel temporaries (upcast, exp,
    #   softmax, selects)                         : ~4 * C * 4
    row_vmem = 2 * classes * itemsize + 2 * 512 + 4 * classes * 4
    budget = max(vmem_limit - 8 * 1024 * 1024, 2 * 1024 * 1024)
    tb_vmem = budget // row_vmem
    # ~4 MiB of logits per tile is already deep into diminishing returns for
    # amortizing the ~0.35 us per-grid-step overhead and DMA issue latency.
    tb_dma = (4 * 1024 * 1024) // max(classes * itemsize, 1)
    rows_per_part = pl.cdiv(batch, num_partitions)
    tb = min(tb_vmem, tb_dma, ((rows_per_part + 7) // 8) * 8)
    return max(8, (int(tb) // 8) * 8)


# --------------------------------------------------------------------------
# Wrapper
# --------------------------------------------------------------------------
def classification_and_gaussian_mdca_loss(logits, targets, *, beta=1.0,
                                          block_rows=None, num_partitions=None):
    """CrossEntropy(logits, targets) + beta * GaussianMDCA(logits, targets)."""
    batch, classes = logits.shape
    itemsize = jnp.dtype(logits.dtype).itemsize
    tgt2d = targets.astype(jnp.int32).reshape(batch, 1)

    if num_partitions is None:
        num_partitions = _default_num_partitions()
    num_partitions = max(1, int(num_partitions))
    vmem_limit = _vmem_limit_bytes()

    if block_rows is None:
        block_rows = _pick_block_rows(batch, classes, itemsize,
                                      num_partitions, vmem_limit)
    tb = max(8, ((int(block_rows) + 7) // 8) * 8)

    total_tiles = pl.cdiv(batch, tb)
    # Balance tile sizes (and, when possible, make them divide B) so the
    # ragged/masked boundary tile shrinks or disappears entirely.
    tb_bal = ((pl.cdiv(batch, total_tiles) + 7) // 8) * 8
    if tb_bal <= tb and pl.cdiv(batch, tb_bal) == total_tiles:
        tb = tb_bal

    P = max(1, min(num_partitions, total_tiles))
    g = pl.cdiv(total_tiles, P)
    has_pad = (P * g * tb != batch)        # some rows of some tile are OOB
    needs_clamp = (P * g > total_tiles)    # some whole tiles are OOB

    if needs_clamp:
        # Fully out-of-range tiles re-read the last valid block (DMA is skipped
        # when the block index repeats); the kernel masks all their rows.
        def row_block(p, i):
            return (jnp.minimum(p * g + i, total_tiles - 1), 0)
    else:
        def row_block(p, i):
            return (p * g + i, 0)

    kernel = functools.partial(_ce_gmdca_kernel, n_valid=batch, block_rows=tb,
                               tiles_per_part=g, has_pad=has_pad)

    cost = pl.CostEstimate(
        flops=int(8 * batch * classes),
        transcendentals=int(batch * classes),
        bytes_accessed=int(batch * classes * itemsize + batch * 4
                           + P * (2 * classes + 1) * 4))

    conf, cnt, ce = pl.pallas_call(
        kernel,
        out_shape=(
            jax.ShapeDtypeStruct((P, 1, classes), jnp.float32),  # sum_b p[b,c]
            jax.ShapeDtypeStruct((P, 1, classes), jnp.float32),  # sum_b [t_b==c]
            jax.ShapeDtypeStruct((P, 1, 1), jnp.float32),        # sum_b CE_b
        ),
        grid=(P, g),
        in_specs=[
            pl.BlockSpec((tb, classes), row_block),
            pl.BlockSpec((tb, 1), row_block),
        ],
        out_specs=(
            pl.BlockSpec((1, 1, classes), lambda p, i: (p, 0, 0)),
            pl.BlockSpec((1, 1, classes), lambda p, i: (p, 0, 0)),
            pl.BlockSpec((1, 1, 1), lambda p, i: (p, 0, 0)),
        ),
        compiler_params=pltpu.CompilerParams(
            # TODO(synk): on v7x verify the partition axis actually shards the
            # two TensorCores; if not, switch it to pltpu.CORE_PARALLEL.
            dimension_semantics=("parallel", "arbitrary"),
            vmem_limit_bytes=int(vmem_limit)),
        cost_estimate=cost,
    )(logits, tgt2d)

    # ---- tiny O(C) finalize (plain XLA) ---------------------------------
    conf_sum = jnp.sum(conf, axis=(0, 1))        # (C,)  sum_b p[b, c]
    cnt_sum = jnp.sum(cnt, axis=(0, 1))          # (C,)  sum_b [t_b == c]
    ce_sum = jnp.sum(ce)

    bf = jnp.float32(batch)
    avg_conf = conf_sum / (bf * bf)              # closed form of Gaussian smoothing
    avg_count = cnt_sum / bf
    gmdca = jnp.sum(jnp.abs(avg_conf - avg_count)) / jnp.float32(classes)
    ce_mean = ce_sum / bf
    return ce_mean + jnp.float32(beta) * gmdca


# --------------------------------------------------------------------------
# Pure-JAX literal reference (vectorized translation of the PyTorch loops)
# --------------------------------------------------------------------------
def _ref_classification_and_gmdca(logits, targets, beta=1.0, sigma=0.05):
    logits = logits.astype(jnp.float32)
    B, C = logits.shape
    # nn.CrossEntropyLoss, mean reduction
    logp = jax.nn.log_softmax(logits, axis=1)
    ce = -jnp.mean(logp[jnp.arange(B), targets])
    # RCR / Gaussian MDCA (with the actual Gaussian pdf, as in the torch loops)
    p = jax.nn.softmax(logits, axis=1)
    norm_const = 1.0 / (sigma * jnp.sqrt(2.0 * jnp.pi))
    total = jnp.float32(0.0)
    for c in range(C):
        pc = p[:, c]                                     # (B,)
        avg_count = jnp.mean((targets == c).astype(jnp.float32))
        diff = pc[None, :] - pc[:, None]                 # [i, j] = p[j,c] - p[i,c]
        gmat = norm_const * jnp.exp(-0.5 * (diff / sigma) ** 2)
        w = gmat / jnp.sum(gmat, axis=1, keepdims=True)  # normalize over j
        conf_gaussian = jnp.sum(pc[:, None] * w, axis=0) / B   # (B,) over j
        avg_conf = jnp.mean(conf_gaussian)
        total = total + jnp.abs(avg_conf - avg_count)
    gmdca = total / C
    return ce + beta * gmdca


if __name__ == "__main__":
    key = jax.random.PRNGKey(0)
    k1, k2, k3, k4 = jax.random.split(key, 4)

    # Small shapes consistent with the module: [batch, classes] logits, int labels.
    batch, classes = 8, 16
    logits = jax.random.normal(k1, (batch, classes), dtype=jnp.float32)
    targets = jax.random.randint(k2, (batch,), 0, classes, dtype=jnp.int32)

    loss = classification_and_gaussian_mdca_loss(logits, targets, beta=1.0)
    loss = jax.block_until_ready(loss)
    ref = _ref_classification_and_gmdca(logits, targets, beta=1.0)
    assert jnp.allclose(loss, ref, atol=2e-3, rtol=2e-3), (loss, ref)

    # Multi-tile / ragged-boundary / two-partition accumulation path (also
    # exercises the masked tile and the clamped index_map for the OOB tile).
    b2, c2 = 37, 16
    logits2 = jax.random.normal(k3, (b2, c2), dtype=jnp.float32)
    targets2 = jax.random.randint(k4, (b2,), 0, c2, dtype=jnp.int32)
    loss2 = classification_and_gaussian_mdca_loss(
        logits2, targets2, beta=1.0, block_rows=8, num_partitions=2)
    loss2 = jax.block_until_ready(loss2)
    ref2 = _ref_classification_and_gmdca(logits2, targets2, beta=1.0)
    assert jnp.allclose(loss2, ref2, atol=2e-3, rtol=2e-3), (loss2, ref2)

    print("KERNEL_OK")
</pallas_src>

<mosaic_0001>
module attributes {stable_mosaic.version = 11 : i64} {
  func.func @_ce_gmdca_kernel(%arg0: i32, %arg1: i32, %arg2: memref<8x16xf32, #tpu.memory_space<vmem>>, %arg3: memref<8x1xi32, #tpu.memory_space<vmem>>, %arg4: memref<1x1x16xf32, #tpu.memory_space<vmem>>, %arg5: memref<1x1x16xf32, #tpu.memory_space<vmem>>, %arg6: memref<1x1x1xf32, #tpu.memory_space<vmem>>) attributes {dimension_semantics = [#tpu.dimension_semantics<parallel>, #tpu.dimension_semantics<arbitrary>], iteration_bounds = array<i64: 1, 1>, scalar_prefetch = 0 : i64, scratch_operands = 0 : i64, tpu.core_type = #tpu.core_type<tc>, window_params = [{transform_indices = @transform_0, window_bounds = array<i64: 8, 16>}, {transform_indices = @transform_1, window_bounds = array<i64: 8, 1>}, {transform_indices = @transform_2, window_bounds = array<i64: 1, 1, 16>}, {transform_indices = @transform_3, window_bounds = array<i64: 1, 1, 16>}, {transform_indices = @transform_4, window_bounds = array<i64: 1, 1, 1>}]} {
    %c0_i32 = arith.constant 0 : i32
    %0 = arith.cmpi eq, %arg1, %c0_i32 : i32
    %1 = arith.extui %0 : i1 to i32
    %c0_i32_0 = arith.constant 0 : i32
    %2 = arith.cmpi ne, %1, %c0_i32_0 : i32
    scf.if %2 {
      %cst_30 = arith.constant 0.000000e+00 : f32
      %46 = vector.broadcast %cst_30 : f32 to vector<1x1x16xf32>
      %c0_31 = arith.constant 0 : index
      %c0_32 = arith.constant 0 : index
      %c0_33 = arith.constant 0 : index
      %47 = vector.load %arg4[%c0_31, %c0_32, %c0_33] : memref<1x1x16xf32, #tpu.memory_space<vmem>>, vector<1x1x16xf32>
      tpu.vector_store %arg4[%c0_31, %c0_32, %c0_33], %46 {strides = array<i32>} : memref<1x1x16xf32, #tpu.memory_space<vmem>>, vector<1x1x16xf32>,
      %cst_34 = arith.constant 0.000000e+00 : f32
      %48 = vector.broadcast %cst_34 : f32 to vector<1x1x16xf32>
      %c0_35 = arith.constant 0 : index
      %c0_36 = arith.constant 0 : index
      %c0_37 = arith.constant 0 : index
      %49 = vector.load %arg5[%c0_35, %c0_36, %c0_37] : memref<1x1x16xf32, #tpu.memory_space<vmem>>, vector<1x1x16xf32>
      tpu.vector_store %arg5[%c0_35, %c0_36, %c0_37], %48 {strides = array<i32>} : memref<1x1x16xf32, #tpu.memory_space<vmem>>, vector<1x1x16xf32>,
      %cst_38 = arith.constant 0.000000e+00 : f32
      %50 = vector.broadcast %cst_38 : f32 to vector<1x1x1xf32>
      %c0_39 = arith.constant 0 : index
      %c0_40 = arith.constant 0 : index
      %c0_41 = arith.constant 0 : index
      %51 = vector.load %arg6[%c0_39, %c0_40, %c0_41] : memref<1x1x1xf32, #tpu.memory_space<vmem>>, vector<1x1x1xf32>
      tpu.vector_store %arg6[%c0_39, %c0_40, %c0_41], %50 {strides = array<i32>} : memref<1x1x1xf32, #tpu.memory_space<vmem>>, vector<1x1x1xf32>,
    } else {
    }
    %c0 = arith.constant 0 : index
    %c0_1 = arith.constant 0 : index
    %3 = vector.load %arg2[%c0, %c0_1] : memref<8x16xf32, #tpu.memory_space<vmem>>, vector<8x16xf32>
    %c0_2 = arith.constant 0 : index
    %c0_3 = arith.constant 0 : index
    %4 = vector.load %arg3[%c0_2, %c0_3] : memref<8x1xi32, #tpu.memory_space<vmem>>, vector<8x1xi32>
    %cst = arith.constant dense<0xFF800000> : vector<8xf32>
    %5 = vector.multi_reduction <maximumf>, %3, %cst [1] : vector<8x16xf32> to vector<8xf32>
    %6 = vector.shape_cast %5 : vector<8xf32> to vector<8x1xf32>
    %7 = vector.broadcast %6 : vector<8x1xf32> to vector<8x16xf32>
    %8 = arith.subf %3, %7 : vector<8x16xf32>
    %9 = math.exp %8 : vector<8x16xf32>
    %cst_4 = arith.constant dense<0.000000e+00> : vector<8xf32>
    %10 = vector.multi_reduction <add>, %9, %cst_4 [1] : vector<8x16xf32> to vector<8xf32>
    %11 = vector.shape_cast %10 : vector<8xf32> to vector<8x1xf32>
    %12 = tpu.reciprocal %11 {approx = true} : vector<8x1xf32> -> vector<8x1xf32>
    %13 = vector.broadcast %12 : vector<8x1xf32> to vector<8x16xf32>
    %14 = arith.mulf %9, %13 : vector<8x16xf32>
    %15 = tpu.iota {dimensions = array<i32: 1>} : vector<8x16xi32>
    %16 = vector.broadcast %4 : vector<8x1xi32> to vector<8x16xi32>
    %17 = arith.cmpi eq, %16, %15 : vector<8x16xi32>
    %cst_5 = arith.constant 0.000000e+00 : f32
    %18 = vector.broadcast %cst_5 : f32 to vector<8x16xf32>
    %19 = arith.select %17, %3, %18 : vector<8x16xi1>, vector<8x16xf32>
    %cst_6 = arith.constant dense<0.000000e+00> : vector<8xf32>
    %20 = vector.multi_reduction <add>, %19, %cst_6 [1] : vector<8x16xf32> to vector<8xf32>
    %21 = vector.shape_cast %20 : vector<8xf32> to vector<8x1xf32>
    %22 = math.log %11 : vector<8x1xf32>
    %23 = arith.addf %6, %22 : vector<8x1xf32>
    %24 = arith.subf %23, %21 : vector<8x1xf32>
    %c0_7 = arith.constant 0 : index
    %c0_8 = arith.constant 0 : index
    %c0_9 = arith.constant 0 : index
    %25 = vector.load %arg4[%c0_7, %c0_8, %c0_9] : memref<1x1x16xf32, #tpu.memory_space<vmem>>, vector<1x1x16xf32>
    %cst_10 = arith.constant dense<0.000000e+00> : vector<16xf32>
    %26 = vector.multi_reduction <add>, %14, %cst_10 [0] : vector<8x16xf32> to vector<16xf32>
    %27 = vector.shape_cast %26 : vector<16xf32> to vector<1x16xf32>
    %28 = vector.shape_cast %27 : vector<1x16xf32> to vector<1x1x16xf32>
    %29 = arith.addf %25, %28 : vector<1x1x16xf32>
    %c0_11 = arith.constant 0 : index
    %c0_12 = arith.constant 0 : index
    %c0_13 = arith.constant 0 : index
    %30 = vector.load %arg4[%c0_11, %c0_12, %c0_13] : memref<1x1x16xf32, #tpu.memory_space<vmem>>, vector<1x1x16xf32>
    tpu.vector_store %arg4[%c0_11, %c0_12, %c0_13], %29 {strides = array<i32>} : memref<1x1x16xf32, #tpu.memory_space<vmem>>, vector<1x1x16xf32>,
    %c0_14 = arith.constant 0 : index
    %c0_15 = arith.constant 0 : index
    %c0_16 = arith.constant 0 : index
    %31 = vector.load %arg5[%c0_14, %c0_15, %c0_16] : memref<1x1x16xf32, #tpu.memory_space<vmem>>, vector<1x1x16xf32>
    %cst_17 = arith.constant 1.000000e+00 : f32
    %cst_18 = arith.constant 0.000000e+00 : f32
    %32 = vector.broadcast %cst_17 : f32 to vector<8x16xf32>
    %33 = vector.broadcast %cst_18 : f32 to vector<8x16xf32>
    %34 = arith.select %17, %32, %33 : vector<8x16xi1>, vector<8x16xf32>
    %cst_19 = arith.constant dense<0.000000e+00> : vector<16xf32>
    %35 = vector.multi_reduction <add>, %34, %cst_19 [0] : vector<8x16xf32> to vector<16xf32>
    %36 = vector.shape_cast %35 : vector<16xf32> to vector<1x16xf32>
    %37 = vector.shape_cast %36 : vector<1x16xf32> to vector<1x1x16xf32>
    %38 = arith.addf %31, %37 : vector<1x1x16xf32>
    %c0_20 = arith.constant 0 : index
    %c0_21 = arith.constant 0 : index
    %c0_22 = arith.constant 0 : index
    %39 = vector.load %arg5[%c0_20, %c0_21, %c0_22] : memref<1x1x16xf32, #tpu.memory_space<vmem>>, vector<1x1x16xf32>
    tpu.vector_store %arg5[%c0_20, %c0_21, %c0_22], %38 {strides = array<i32>} : memref<1x1x16xf32, #tpu.memory_space<vmem>>, vector<1x1x16xf32>,
    %c0_23 = arith.constant 0 : index
    %c0_24 = arith.constant 0 : index
    %c0_25 = arith.constant 0 : index
    %40 = vector.load %arg6[%c0_23, %c0_24, %c0_25] : memref<1x1x1xf32, #tpu.memory_space<vmem>>, vector<1x1x1xf32>
    %cst_26 = arith.constant dense<0.000000e+00> : vector<1xf32>
    %41 = vector.multi_reduction <add>, %24, %cst_26 [0] : vector<8x1xf32> to vector<1xf32>
    %42 = vector.shape_cast %41 : vector<1xf32> to vector<1x1xf32>
    %43 = vector.shape_cast %42 : vector<1x1xf32> to vector<1x1x1xf32>
    %44 = arith.addf %40, %43 : vector<1x1x1xf32>
    %c0_27 = arith.constant 0 : index
    %c0_28 = arith.constant 0 : index
    %c0_29 = arith.constant 0 : index
    %45 = vector.load %arg6[%c0_27, %c0_28, %c0_29] : memref<1x1x1xf32, #tpu.memory_space<vmem>>, vector<1x1x1xf32>
    tpu.vector_store %arg6[%c0_27, %c0_28, %c0_29], %44 {strides = array<i32>} : memref<1x1x1xf32, #tpu.memory_space<vmem>>, vector<1x1x1xf32>,
    return
  }
  func.func @transform_0(%arg0: i32, %arg1: i32) -> (i32, i32) {
    %c1_i32 = arith.constant 1 : i32
    %0 = arith.muli %arg0, %c1_i32 : i32
    %1 = arith.addi %0, %arg1 : i32
    %c0_i32 = arith.constant 0 : i32
    %c0_i32_0 = arith.constant 0 : i32
    return %1, %c0_i32 : i32, i32
  }
  func.func @transform_1(%arg0: i32, %arg1: i32) -> (i32, i32) {
    %c1_i32 = arith.constant 1 : i32
    %0 = arith.muli %arg0, %c1_i32 : i32
    %1 = arith.addi %0, %arg1 : i32
    %c0_i32 = arith.constant 0 : i32
    %c0_i32_0 = arith.constant 0 : i32
    return %1, %c0_i32 : i32, i32
  }
  func.func @transform_2(%arg0: i32, %arg1: i32) -> (i32, i32, i32) {
    %c0_i32 = arith.constant 0 : i32
    %c0_i32_0 = arith.constant 0 : i32
    %c0_i32_1 = arith.constant 0 : i32
    return %arg0, %c0_i32, %c0_i32_0 : i32, i32, i32
  }
  func.func @transform_3(%arg0: i32, %arg1: i32) -> (i32, i32, i32) {
    %c0_i32 = arith.constant 0 : i32
    %c0_i32_0 = arith.constant 0 : i32
    %c0_i32_1 = arith.constant 0 : i32
    return %arg0, %c0_i32, %c0_i32_0 : i32, i32, i32
  }
  func.func @transform_4(%arg0: i32, %arg1: i32) -> (i32, i32, i32) {
    %c0_i32 = arith.constant 0 : i32
    %c0_i32_0 = arith.constant 0 : i32
    %c0_i32_1 = arith.constant 0 : i32
    return %arg0, %c0_i32, %c0_i32_0 : i32, i32, i32
  }
}

</mosaic_0001>

<bundles_post_ra>
// kernel: tpu_custom_call.1
= control target key start
LH: loop header
LB: loop body
LE: loop exit
PB: predicated region body
PF: predicated region fallthrough
CT: control target
= control target key end

     0   :  { %10 = vsyncpa [#allocation3], 0  ;;  %vm61_vm0 = vcmask 130048   ;;  %s337_s0 = inlined_call_operand.vmem [shape: f32[8,16], index: 0, kind: input, shape index: {}]   ;;  %s338_s1 = inlined_call_operand.vmem [shape: s32[8,1], index: 1, kind: input, shape index: {}]   ;;  %s339_s2 = inlined_call_operand.hbm [shape: f32[1,1,16], index: 2, kind: output, shape index: {0}]   ;;  %s340_s3 = inlined_call_operand.hbm [shape: f32[1,1,16], index: 3, kind: output, shape index: {1}]   ;;  %s341_s4 = inlined_call_operand.hbm [shape: f32[1,1,1], index: 4, kind: output, shape index: {2}]  }
   0x1   :  { %v59_v0 = vld [vmem:[%s337_s0] sm:$0xff] }
   0x2   :  { %11 = vsyncpa [#allocation5], 0  ;;  %v62_v1 = vsel %vm61_vm0, %v59_v0, -inf  ;;  %v254_v2 = vmov 0   ;;  %v60_v3 = vld [vmem:[%s338_s1] sm:$0xff]  ;;  %vm54_vm1 = vcmask 122880   ;;  %v73_v7 = vlaneseq }
   0x3   :  { %177 = vset.pattern.permute.xlu0 %v254_v2  ;;  %v255_v4 = vmov 0.0   ;;  %vm57_vm3 = vcmask 0   ;;  %s256_s0 = smov [#allocation4]  }
   0x4   :  { %63 = vmax.xlane.f32.xlu0 %v62_v1  ;;  %56 = vst.msk [vmem:[#allocation4] sm:$0x1] %vm54_vm1, %v255_v4  ;;  %55 = vst.msk [vmem:[#allocation2] sm:$0x1] %vm54_vm1, %v255_v4  ;;  %v74_v9 = vand.u32 127, %v73_v7  ;;  %s135_s1 = sshll.u32 %s256_s0, 4  ;;  %s136_s1 = int_to_ptr.vmem [resolvable:$true] %s135_s1 }
   0x5   :  { %58 = vst.msk [vmem:[#allocation6] sm:$0x1] %vm57_vm3, %v255_v4  ;;  %s184_s19 = scalar_lea.vmem %s136_s1, 16  ;;  %s188_s20 = scalar_lea.vmem %s136_s1, 32 }
   0x6   :  { %p185_p0 = scmp.ne.s32.totalorder %s136_s1, %s184_s19  ;;  %p189_p1 = scmp.lt.s32.totalorder %s136_s1, %s136_s1 }
   0x7   :  { %p190_p2 = scmp.lt.s32.totalorder %s188_s20, %s184_s19 }
   0x9   :  { %p191_p3 = por %p190_p2, %p189_p1 }
   0xb   :  { %v98_v22 = vld [vmem:[#allocation4] sm:$0x1]  ;;  %p192_p4 = pnand %p191_p3, %p185_p0 }
  0x1a   :  { %76 = vperm.xlu0 %177, %v60_v3  }
  0x91   :  { %v64_v5 = vpop.xlane.xlu0 %63 }
  0x92   :  { %v65_v6 = vsub.f32 %v59_v0, %v64_v5 }
  0x94   :  { %v66_v8 = vmul.f32 1.442695, %v65_v6 }
  0x96   :  { %178 = vpow2.f32 %v66_v8 }
  0x99   :  { %v77_v10 = vpop.permute.xlu0 %76 }
  0x9a   :  { %vm78_vm2 = vcmp.eq.s32.totalorder %v77_v10, %v74_v9 }
  0x9b   :  { %v99_v11 = vsel %vm78_vm2, 1.0, %v255_v4  ;;  %v79_v16 = vsel %vm78_vm2, %v59_v0, 0.0 }
  0x9c   :  { %v100_v12 = vsel %vm61_vm0, %v99_v11, 0.0  ;;  %v80_v20 = vsel %vm61_vm0, %v79_v16, 0.0 }
  0x9d   :  { %v101_v13 = vrot.slane %v100_v12, 4 }
  0x9f   :  { %v102_v14 = vadd.f32 %v101_v13, %v100_v12 }
  0xa0   :  { %v179_v15 = vpop.eup %178 }
  0xa1   :  { %v68_v17 = vsel %vm61_vm0, %v179_v15, 0.0  ;;  %v103_v18 = vrot.slane %v102_v14, 2 }
  0xa2   :  { %69 = vadd.xlane.f32.xlu1 %v68_v17 }
  0xa3   :  { %v104_v19 = vadd.f32 %v103_v18, %v102_v14 }
  0xa5   :  { %v105_v21 = vrot.slane %v104_v19, 1 }
  0xa6   :  { %81 = vadd.xlane.f32.xlu1 %v80_v20 }
  0xa7   :  { %v106_v23 = vadd.f32 %v105_v21, %v104_v19 }
  0xa9   :  { %v107_v24 = vadd.f32 %v106_v23, %v98_v22 }
  0xab   :  { %108 = vst.msk [vmem:[#allocation4] sm:$0x1] %vm54_vm1, %v107_v24 }
  0xac   :  { %195 = shalt.err (!%p192_p4)
}
  0xad   :  { %s196_s23 = scalar_lea.hbm %s340_s3, 16 }
  0xae   :  { %p197_p5 = scmp.ne.s32.totalorder %s340_s3, %s196_s23  ;;  %p200_p6 = scmp.lt.u32.totalorder %s196_s23, %s340_s3 }
  0xb0   :  { %p202_p7 = pnand %p200_p6, %p197_p5 }
  0xb2   :  { %205 = shalt.err (!%p202_p7)
}
  0xb3   :  { %138 = dma.vmem_to_hbm [thread:$0]  %s136_s1, 16, %s340_s3, [#allocation5]   ;;  %v87_v42 = vld [vmem:[#allocation2] sm:$0x1]  ;;  %v109_v47 = vld [vmem:[#allocation6] sm:$0x1] }
  0xb4   :  { %s257_s3 = smov [#allocation2]   ;;  %s258_s5 = smov [#allocation6]  }
  0xb5   :  { %s125_s30 = sshll.u32 %s257_s3, 4  ;;  %s145_s6 = sshll.u32 %s258_s5, 4  ;;  %s126_s30 = int_to_ptr.vmem [resolvable:$true] %s125_s30  ;;  %s146_s6 = int_to_ptr.vmem [resolvable:$true] %s145_s6 }
  0xb6   :  { %s206_s7 = scalar_lea.vmem %s126_s30, 16  ;;  %s210_s8 = scalar_lea.vmem %s126_s30, 32 }
  0xb7   :  { %p207_p8 = scmp.ne.s32.totalorder %s126_s30, %s206_s7  ;;  %p211_p9 = scmp.lt.s32.totalorder %s126_s30, %s126_s30 }
  0xb8   :  { %p212_p10 = scmp.lt.s32.totalorder %s210_s8, %s206_s7 }
  0xba   :  { %p213_p11 = por %p212_p10, %p211_p9 }
  0xbc   :  { %p214_p12 = pnand %p213_p11, %p207_p8 }
 0x12f   :  { %v70_v25 = vpop.xlane.xlu1 %69 }
 0x130   :  { %180 = vrcp.f32 %v70_v25 }
 0x131   :  { %182 = vlog2.f32 %v70_v25 }
 0x133   :  { %v82_v30 = vpop.xlane.xlu1 %81 }
 0x13a   :  { %v181_v26 = vpop.eup %180 }
 0x13b   :  { %v183_v27 = vpop.eup %182  ;;  %v72_v28 = vmul.f32 %v181_v26, %v179_v15 }
 0x13c   :  { %v84_v29 = vmul.f32 0.6931472, %v183_v27 }
 0x13d   :  { %v88_v31 = vsel %vm61_vm0, %v72_v28, 0.0 }
 0x13e   :  { %v85_v32 = vadd.f32 %v84_v29, %v64_v5  ;;  %v89_v33 = vrot.slane %v88_v31, 4 }
 0x140   :  { %v86_v34 = vsub.f32 %v85_v32, %v82_v30  ;;  %v90_v35 = vadd.f32 %v89_v33, %v88_v31 }
 0x142   :  { %v110_v36 = vrot.slane %v86_v34, 4  ;;  %v91_v37 = vrot.slane %v90_v35, 2 }
 0x144   :  { %v111_v38 = vadd.f32 %v110_v36, %v86_v34  ;;  %v92_v39 = vadd.f32 %v91_v37, %v90_v35 }
 0x146   :  { %v112_v40 = vrot.slane %v111_v38, 2  ;;  %v93_v41 = vrot.slane %v92_v39, 1 }
 0x148   :  { %v113_v43 = vadd.f32 %v112_v40, %v111_v38  ;;  %v94_v44 = vadd.f32 %v93_v41, %v92_v39 }
 0x14a   :  { %v114_v45 = vrot.slane %v113_v43, 1  ;;  %v95_v46 = vadd.f32 %v94_v44, %v87_v42 }
 0x14c   :  { %v115_v48 = vadd.f32 %v114_v45, %v113_v43  ;;  %97 = vst.msk [vmem:[#allocation2] sm:$0x1] %vm54_vm1, %v95_v46 }
 0x14d   :  { %217 = shalt.err (!%p214_p12)
}
 0x14e   :  { %s218_s11 = scalar_lea.hbm %s339_s2, 16 }
 0x14f   :  { %p219_p13 = scmp.ne.s32.totalorder %s339_s2, %s218_s11  ;;  %p222_p0 = scmp.lt.u32.totalorder %s218_s11, %s339_s2 }
 0x151   :  { %p224_p1 = pnand %p222_p0, %p219_p13 }
 0x153   :  { %227 = shalt.err (!%p224_p1)
}
 0x154   :  { %128 = dma.vmem_to_hbm [thread:$0]  %s126_s30, 16, %s339_s2, [#allocation3]   ;;  %v116_v49 = vadd.f32 %v115_v48, %v109_v47 }
 0x155   :  { %s228_s18 = scalar_lea.vmem %s146_s6, 16  ;;  %s232_s0 = scalar_lea.vmem %s146_s6, 32 }
 0x156   :  { %118 = vst.msk [vmem:[#allocation6] sm:$0x1] %vm57_vm3, %v116_v49  ;;  %p229_p2 = scmp.ne.s32.totalorder %s146_s6, %s228_s18  ;;  %p233_p3 = scmp.lt.s32.totalorder %s146_s6, %s146_s6 }
 0x157   :  { %p234_p4 = scmp.lt.s32.totalorder %s232_s0, %s228_s18 }
 0x159   :  { %p235_p5 = por %p234_p4, %p233_p3 }
 0x15b   :  { %p236_p6 = pnand %p235_p5, %p229_p2 }
 0x15d   :  { %239 = shalt.err (!%p236_p6)
}
 0x15e   :  { %s240_s20 = scalar_lea.hbm %s341_s4, 16 }
 0x15f   :  { %p241_p7 = scmp.ne.s32.totalorder %s341_s4, %s240_s20  ;;  %p244_p8 = scmp.lt.u32.totalorder %s240_s20, %s341_s4 }
 0x161   :  { %p246_p9 = pnand %p244_p8, %p241_p7 }
 0x163   :  { %249 = shalt.err (!%p246_p9)
}
 0x164   :  { %148 = dma.vmem_to_hbm [thread:$0]  %s146_s6, 16, %s341_s4, [#allocation5]  }
 0x165   :  { %250 = dma.done.wait [#allocation3], 16  }
 0x166   :  { %251 = vsyncadd [#allocation3], 4294967280 }
 0x167   :  { %252 = dma.done.wait [#allocation5], 32  }
 0x168   :  { %253 = vsyncadd [#allocation5], 4294967264 }
 0x169   :  { %158 = vsyncpa [#allocation3], 1 }
 0x16a   :  { %159 = vsyncpa [#allocation5], 1 }

</bundles_post_ra>
